<compile_context>
chip_gen: v5e
topology: v5e:2x2
jax: 0.10.0
libtpu: 0.0.40
codegen_flags: <defaults>
</compile_context>

<pallas_src>
import jax
import jax.numpy as jnp
from jax.experimental import pallas as pl
from jax.experimental.pallas import tpu as pltpu

VANDERWAAL = {'H': 1.2, 'C': 1.7, 'N': 1.55, 'O': 1.52, 'F': 1.8,
              'P': 1.75, 'S': 1.85, 'Cl': 1.47, 'Br': 1.8, 'I': 1.98}

LANE = 128
SUBLANE = 8


def lor_kernel(x_ref, kappa_ref, c_ref, o_ref):
    # x_ref: (tb, tl); kappa_ref / c_ref: (1, tl), pre-clamped / pre-folded.
    x = x_ref[...].astype(jnp.float32)
    t = kappa_ref[...] * jnp.log(x) + c_ref[...]          # = kappa_c * log(x / eta_c)
    # Lorentz: 1/(1 + exp(t)) == sigmoid(-t) == 0.5*(1 + tanh(-t/2))
    o_ref[...] = (0.5 * (1.0 + jnp.tanh(-0.5 * t))).astype(o_ref.dtype)


def _round_up(v, m):
    return ((v + m - 1) // m) * m


def _pick_tiles(B, N, elem_bytes, target_block_bytes, min_steps=8):
    """Pick (tb, tl).

    tb: multiple of 8 (or == B when B < 8); tl: multiple of 128 (or == N).
    Block sized toward target_block_bytes, then shrunk (rows first, then
    columns) until the ceil-divide grid has >= min_steps steps when possible,
    so the DMA pipeline always has work and v7x can shard across both TCs.
    """
    row_g = SUBLANE if B >= SUBLANE else B

    if N % LANE != 0:
        tl = N  # last dim must be a multiple of 128 or the full extent
    else:
        tl = N
        while row_g * tl * elem_bytes > target_block_bytes and tl > LANE:
            tl = max(LANE, (tl // 2) // LANE * LANE)

    tb = row_g
    while tb + row_g <= B and (tb + row_g) * tl * elem_bytes <= target_block_bytes:
        tb += row_g

    def steps(tb_, tl_):
        return pl.cdiv(B, tb_) * pl.cdiv(N, tl_)

    while steps(tb, tl) < min_steps and tb > row_g:
        tb -= row_g
    if N % LANE == 0:
        while steps(tb, tl) < min_steps and tl > 4 * LANE:
            tl = max(4 * LANE, _round_up(tl // 2, LANE))

    return tb, tl


def esggr_lor(x, eta, kappa, *, out_dtype=jnp.float32,
              target_block_bytes=6 << 20, min_steps=8):
    """x: [B, G, L] positive distances, eta/kappa: [G] per-group parameters."""
    B, G, L = x.shape
    N = G * L
    x2 = x.reshape(B, N)  # lane-dense 2D view; contiguous -> free reshape

    # Fold the clamp and the per-group constant on the tiny [G] vectors, then
    # broadcast to a lane-dense (1, G*L) row that tiles with the column axis.
    eta_c = jnp.maximum(eta.astype(jnp.float32), 0.01)
    kappa_c = jnp.maximum(kappa.astype(jnp.float32), 0.01)
    c_c = -kappa_c * jnp.log(eta_c)
    kappa_row = jnp.broadcast_to(kappa_c[:, None], (G, L)).reshape(1, N)
    c_row = jnp.broadcast_to(c_c[:, None], (G, L)).reshape(1, N)

    in_eb = x2.dtype.itemsize
    out_eb = jnp.dtype(out_dtype).itemsize
    tb, tl = _pick_tiles(B, N, in_eb, target_block_bytes, min_steps)
    grid = (pl.cdiv(B, tb), pl.cdiv(N, tl))

    # Double-buffered in + out blocks + param rows, plus slack; cap at 48 MiB
    # so the config also fits v7x's 64 MiB physical VMEM.
    vmem_need = 2 * (tb * tl * (in_eb + out_eb) + 2 * tl * 4)
    vmem_limit = int(min(48 << 20, max(32 << 20, vmem_need + (4 << 20))))

    cost = pl.CostEstimate(
        flops=5 * B * N,
        transcendentals=2 * B * N,
        bytes_accessed=B * N * (in_eb + out_eb) + 2 * N * 4,
    )

    out2 = pl.pallas_call(
        lor_kernel,
        out_shape=jax.ShapeDtypeStruct((B, N), out_dtype),
        grid=grid,
        in_specs=[
            pl.BlockSpec((tb, tl), lambda i, j: (i, j)),
            pl.BlockSpec((1, tl), lambda i, j: (0, j)),
            pl.BlockSpec((1, tl), lambda i, j: (0, j)),
        ],
        out_specs=pl.BlockSpec((tb, tl), lambda i, j: (i, j)),
        compiler_params=pltpu.CompilerParams(
            dimension_semantics=("parallel", "parallel"),
            vmem_limit_bytes=vmem_limit,
        ),
        cost_estimate=cost,
    )(x2, kappa_row, c_row)

    return out2.reshape(B, G, L)


def init_esggr_params(key, kappa_rng=(5.0, 8.0), tau_rng=(0.5, 1.5)):
    """Deterministic re-implementation of ESGGR.__init__ parameter setup."""
    elems = list(VANDERWAAL.keys())          # 10 elements
    num_grps = len(elems) * len(elems)       # 100
    k_key, t_key = jax.random.split(key)
    kappa = jax.random.uniform(k_key, (num_grps,), jnp.float32,
                               minval=kappa_rng[0], maxval=kappa_rng[1])
    tau = jax.random.uniform(t_key, (), jnp.float32,
                             minval=tau_rng[0], maxval=tau_rng[1])
    eta_base = jnp.zeros((num_grps,), jnp.float32)
    for i, e1 in enumerate(elems):
        for j, e2 in enumerate(elems):
            eta_base = eta_base.at[i * 10 + j].set(VANDERWAAL[e1] + VANDERWAAL[e2])
    eta = tau * eta_base
    return eta, kappa, num_grps


def esggr_lor_ref(x, eta, kappa):
    """Pure-JAX reference (original exp/divide formulation) for correctness checking."""
    eta_c = jnp.maximum(eta, 0.01)[None, :, None]
    kap_c = jnp.maximum(kappa, 0.01)[None, :, None]
    return 1.0 / (1.0 + jnp.exp(kap_c * jnp.log(x / eta_c)))


if __name__ == "__main__":
    key = jax.random.PRNGKey(0)
    p_key, x_key = jax.random.split(key)

    eta, kappa, num_grps = init_esggr_params(p_key)   # num_grps = 100
    B, G, L = 4, num_grps, 128
    # strictly positive pairwise distances (Angstrom-ish range); log(x) requires x > 0
    x = jax.random.uniform(x_key, (B, G, L), jnp.float32, minval=0.5, maxval=10.0)

    out = esggr_lor(x, eta, kappa)
    out = jax.block_until_ready(out)

    ref = esggr_lor_ref(x, eta, kappa)
    assert out.shape == (B, G, L)
    # sigmoid/tanh reformulation + folded log(eta): tolerance relaxed slightly vs exp form
    assert jnp.allclose(out, ref, atol=3e-5, rtol=3e-5), "mismatch vs JAX reference"

    # TODO(synk): the 4*num_grps statistical feature aggregation implied by
    # self.num_feat is not part of ESGGR.forward in the reference, so it is not modeled.
    print("KERNEL_OK")
</pallas_src>

<mosaic_0001>
module attributes {stable_mosaic.version = 11 : i64} {
  func.func @lor_kernel(%arg0: i32, %arg1: i32, %arg2: memref<4x1664xf32, #tpu.memory_space<vmem>>, %arg3: memref<1x1664xf32, #tpu.memory_space<vmem>>, %arg4: memref<1x1664xf32, #tpu.memory_space<vmem>>, %arg5: memref<4x1664xf32, #tpu.memory_space<vmem>>) attributes {dimension_semantics = [#tpu.dimension_semantics<parallel>, #tpu.dimension_semantics<parallel>], iteration_bounds = array<i64: 1, 8>, scalar_prefetch = 0 : i64, scratch_operands = 0 : i64, tpu.core_type = #tpu.core_type<tc>, window_params = [{transform_indices = @transform_0, window_bounds = array<i64: 4, 1664>}, {transform_indices = @transform_1, window_bounds = array<i64: 1, 1664>}, {transform_indices = @transform_2, window_bounds = array<i64: 1, 1664>}, {transform_indices = @transform_3, window_bounds = array<i64: 4, 1664>}]} {
    %c0 = arith.constant 0 : index
    %c0_0 = arith.constant 0 : index
    %0 = vector.load %arg2[%c0, %c0_0] : memref<4x1664xf32, #tpu.memory_space<vmem>>, vector<4x1664xf32>
    %c0_1 = arith.constant 0 : index
    %c0_2 = arith.constant 0 : index
    %1 = vector.load %arg3[%c0_1, %c0_2] : memref<1x1664xf32, #tpu.memory_space<vmem>>, vector<1x1664xf32>
    %2 = math.log %0 : vector<4x1664xf32>
    %3 = vector.broadcast %1 : vector<1x1664xf32> to vector<4x1664xf32>
    %4 = arith.mulf %3, %2 : vector<4x1664xf32>
    %c0_3 = arith.constant 0 : index
    %c0_4 = arith.constant 0 : index
    %5 = vector.load %arg4[%c0_3, %c0_4] : memref<1x1664xf32, #tpu.memory_space<vmem>>, vector<1x1664xf32>
    %6 = vector.broadcast %5 : vector<1x1664xf32> to vector<4x1664xf32>
    %7 = arith.addf %4, %6 : vector<4x1664xf32>
    %cst = arith.constant -5.000000e-01 : f32
    %8 = vector.broadcast %cst : f32 to vector<4x1664xf32>
    %9 = arith.mulf %8, %7 : vector<4x1664xf32>
    %10 = math.tanh %9 : vector<4x1664xf32>
    %cst_5 = arith.constant 1.000000e+00 : f32
    %11 = vector.broadcast %cst_5 : f32 to vector<4x1664xf32>
    %12 = arith.addf %11, %10 : vector<4x1664xf32>
    %cst_6 = arith.constant 5.000000e-01 : f32
    %13 = vector.broadcast %cst_6 : f32 to vector<4x1664xf32>
    %14 = arith.mulf %13, %12 : vector<4x1664xf32>
    %c0_7 = arith.constant 0 : index
    %c0_8 = arith.constant 0 : index
    %15 = vector.load %arg5[%c0_7, %c0_8] : memref<4x1664xf32, #tpu.memory_space<vmem>>, vector<4x1664xf32>
    tpu.vector_store %arg5[%c0_7, %c0_8], %14 {strides = array<i32>} : memref<4x1664xf32, #tpu.memory_space<vmem>>, vector<4x1664xf32>,
    return
  }
  func.func @transform_0(%arg0: i32, %arg1: i32) -> (i32, i32) {
    %c0_i32 = arith.constant 0 : i32
    return %arg0, %arg1 : i32, i32
  }
  func.func @transform_1(%arg0: i32, %arg1: i32) -> (i32, i32) {
    %c0_i32 = arith.constant 0 : i32
    %c0_i32_0 = arith.constant 0 : i32
    return %c0_i32, %arg1 : i32, i32
  }
  func.func @transform_2(%arg0: i32, %arg1: i32) -> (i32, i32) {
    %c0_i32 = arith.constant 0 : i32
    %c0_i32_0 = arith.constant 0 : i32
    return %c0_i32, %arg1 : i32, i32
  }
  func.func @transform_3(%arg0: i32, %arg1: i32) -> (i32, i32) {
    %c0_i32 = arith.constant 0 : i32
    return %arg0, %arg1 : i32, i32
  }
}

</mosaic_0001>

<bundles_post_ra>
// kernel: tpu_custom_call.1
= control target key start
LH: loop header
LB: loop body
LE: loop exit
PB: predicated region body
PF: predicated region fallthrough
CT: control target
= control target key end

     0   :  { %8 = vsyncpa [#allocation3], 0  ;;  %s1373_s0 = inlined_call_operand.hbm [shape: f32[4,12800], index: 0, kind: input, shape index: {}]   ;;  %s1374_s1 = inlined_call_operand.hbm [shape: f32[1,12800], index: 1, kind: input, shape index: {}]   ;;  %s1375_s2 = inlined_call_operand.hbm [shape: f32[1,12800], index: 2, kind: input, shape index: {}]   ;;  %s1376_s3 = inlined_call_operand.hbm [shape: f32[4,12800], index: 3, kind: output, shape index: {}]  }
   0x1   :  { %10 = vsyncpa [#allocation3 + $0x1], 0 }
   0x2   :  { %11 = vsyncpa [#allocation6], 0 }
   0x3   :  { %13 = vsyncpa [#allocation6 + $0x1], 0 }
   0x4   :  { %14 = vsyncpa [#allocation4], 0 }
   0x5   :  { %16 = vsyncpa [#allocation4 + $0x1], 0  ;;  %s1073_s12 = smov 0   ;;  %s1075_s13 = smov 0  }
   0x6   :  { %s1077_s14 = smov 0   ;;  %s1079_s15 = smov 0  }
   0x7   :  { %s1081_s16 = smov 0   ;;  %s1083_s17 = smov 0  }
   0x8 LB: > { %s1104_s18 = sadd.s32 4294967295, %s1047_s17   ;;  %s711_s19 = sadd.s32 4294967294, %s1047_s17   ;;  %s1047_s17 = sphi %s1083_s17, %s22_s17   ;;  %s1043_s16 = sphi %s1081_s16, %s1392_s16   ;;  %s1039_s15 = sphi %s1079_s15, %s1391_s15   ;;  %s1035_s14 = sphi %s1077_s14, %s1390_s14   ;;  %s1031_s13 = sphi %s1075_s13, %s1389_s13   ;;  %s1027_s12 = sphi %s1073_s12, %s1388_s12  }
   0x9   : > { %s31_s20 = sadd.s32 1, %s1043_s16  ;;  %s43_s21 = sadd.s32 1, %s1035_s14 }
   0xa   : > { %p32_p0 = scmp.ge.s32.totalorder %s31_s20, 8  ;;  %p50_p1 = scmp.ne.s32.totalorder %s1035_s14, %s1031_s13 }
   0xb   : > { %p51_p2 = scmp.eq.s32.totalorder %s1047_s17, 0  ;;  %p56_p3 = scmp.ne.s32.totalorder %s1031_s13, %s1027_s12 }
   0xc   : > { %s1394_s20 = smov (%p32_p0, %s31_s20), 0  ;;  %p57_p5 = scmp.eq.s32.totalorder %s1104_s18, 0 }
   0xd   : > { %1378 = sst [smem:[#allocation12_spill]] %s1394_s20  ;;  %p1116_p4 = por %p51_p2, %p50_p1 }
   0xe   : > { %s39_s23 = ssub.s32 %s1043_s16, %s1394_s20  ;;  %p134_p6 = scmp.eq.s32.totalorder %s1104_s18, 7 }
   0xf   : > { %p41_p7 = scmp.eq.s32.totalorder %s39_s23, 0  ;;  %p1124_p8 = por %p57_p5, %p56_p3 }
  0x10   : > { %p1128_p9 = por %p134_p6, %p50_p1  ;;  %p140_p10 = scmp.eq.s32.totalorder %s711_s19, 7 }
  0x11   : > { %s1133_s26 = scalar_select %p41_p7, %s1035_s14, %s43_s21  }
  0x12   : > { %p1135_p11 = por %p140_p10, %p56_p3  ;;  %p713_p12 = scmp.ge.s32.totalorder %s1047_s17, 8 }
  0x13   : > { %1382 = sst [smem:[#allocation13_spill]] %s1133_s26 }
  0x14   : > { %156 = sbr.rel (%p713_p12) target bundleno = 132 (0x84), region = 16 }
  0x19   : > { %159 = sbr.rel (!%p1116_p4) target bundleno = 62 (0x3e), region = 20  ;;  %s160_s28 = sand.u32 (%p1116_p4), 1, %s1035_s14  }
  0x1a   : > { %s165_s29 = smul.u32 (%p1116_p4), 13, %s1043_s16  ;;  %s1147_s8 = scalar_lea.sflag (%p1116_p4), [#allocation3], %s160_s28 }
  0x1b   : > { %s731_s30 = smul.u32 (%p1116_p4), 52, %s160_s28 }
  0x1c   : > { %s166_s4 = ssub.s32 (%p1116_p4), 100, %s165_s29 }
  0x1d   : > { %p167_p13 = scmp.lt.s32.totalorder (%p1116_p4), %s166_s4, 13  ;;  %s164_s9 = scalar_lea.vmem (%p1116_p4), [#allocation2], %s731_s30 }
  0x1f   : > { %s1396_s4 = smov (!%p167_p13, %s166_s4), 13 }
  0x20   : > { %s714_s5 = sshll.u32 %s1396_s4, 2 }
  0x21   : > { %s170_s6 = ssub.s32 52, %s714_s5 }
  0x22   : > { %s171_s7 = sshll.u32 %s170_s6, 4 }
  0x23   : > { %172 = vsyncadd %s1147_s8, %s171_s7  ;;  %p1150_p0 = scmp.ne.s32.totalorder %s714_s5, 0  ;;  %s729_s11 = smul.u32 52, %s1043_s16 }
  0x24   : > { %s718_s19 = sshll.u32 %s1396_s4, 6  ;;  %s1156_s21 = sshll.u32 %s164_s9, 4  ;;  %s183_s21 = int_to_ptr.vmem [resolvable:$true] %s1156_s21 }
  0x25   : > { %s177_s28 = scalar_lea.hbm %s1373_s0, %s729_s11  ;;  %s835_s5 = sshrl.u32 %s718_s19, 4 }
  0x26   : > { %s180_s30 = sshll.u32 %s177_s28, 4  ;;  %s844_s26 = scalar_lea.hbm %s1373_s0, 400  ;;  %s181_s30 = int_to_ptr.hbm [resolvable:$true] %s180_s30 }
  0x27   : > { %s833_s6 = sshra.s32 %s181_s30, 4  ;;  %s834_s6 = int_to_ptr.hbm [resolvable:$true] %s833_s6 }
  0x28   : > { %s840_s7 = scalar_lea.hbm %s834_s6, %s835_s5 }
  0x29   : > { %p841_p1 = scmp.ne.s32.totalorder %s834_s6, %s840_s7  ;;  %p846_p5 = scmp.lt.s32.totalorder %s844_s26, %s840_s7 }
  0x2b   : > { %p842_p2 = pnand %p841_p1, %p1150_p0 }
  0x2d   : > { %p843_p3 = pneg %p842_p2 }
  0x2f   : > { %p848_p6 = pnand %p846_p5, %p843_p3 }
  0x31   : > { %851 = shalt.err (!%p848_p6)
}
  0x32   : > { %s852_s11 = sshra.s32 %s183_s21, 4  ;;  %s1049_s29 = smov [#allocation2]   ;;  %s853_s11 = int_to_ptr.vmem [resolvable:$true] %s852_s11 }
  0x33   : > { %s859_s23 = scalar_lea.vmem %s853_s11, %s835_s5  ;;  %s863_s28 = scalar_lea.vmem %s1049_s29, 104 }
  0x34   : > { %p860_p7 = scmp.ne.s32.totalorder %s853_s11, %s859_s23  ;;  %p865_p13 = scmp.lt.s32.totalorder %s863_s28, %s859_s23 }
  0x36   : > { %p861_p10 = pnand %p860_p7, %p1150_p0 }
  0x38   : > { %p862_p12 = pneg %p861_p10 }
  0x3a   : > { %p867_p1 = pnand %p865_p13, %p862_p12 }
  0x3c   : > { %870 = shalt.err (!%p867_p1)
}
  0x3d   : > { %185 = dma.hbm_to_vmem [thread:$0]  (%p1150_p0), %s181_s30, %s718_s19, %s183_s21, %s1147_s8  }
  0x3e PF: > { %188 = sbr.rel (!%p1116_p4) target bundleno = 97 (0x61), region = 24  ;;  %s189_s20 = sand.u32 (%p1116_p4), 1, %s1047_s17  }
  0x3f   : > { %s191_s26 = sand.u32 (%p1116_p4), 1, %s1035_s14   ;;  %s194_s5 = smul.u32 (%p1116_p4), 13, %s1043_s16 }
  0x40   : > { %s732_s6 = smul.u32 (%p1116_p4), 13, %s191_s26  ;;  %s1184_s4 = scalar_lea.sflag (%p1116_p4), [#allocation6], %s189_s20 }
  0x41   : > { %s195_s7 = ssub.s32 (%p1116_p4), 100, %s194_s5 }
  0x42   : > { %p196_p2 = scmp.lt.s32.totalorder (%p1116_p4), %s195_s7, 13  ;;  %s193_s8 = scalar_lea.vmem (%p1116_p4), [#allocation5], %s732_s6 }
  0x44   : > { %s1398_s7 = smov (!%p196_p2, %s195_s7), 13 }
  0x45   : > { %s198_s10 = ssub.s32 13, %s1398_s7 }
  0x46   : > { %s199_s9 = sshll.u32 %s198_s10, 4 }
  0x47   : > { %200 = vsyncadd %s1184_s4, %s199_s9  ;;  %p719_p0 = scmp.ne.s32.totalorder %s1398_s7, 0  ;;  %s202_s30 = scalar_lea.hbm %s1374_s1, %s194_s5 }
  0x48   : > { %s203_s11 = sshll.u32 %s1398_s7, 4  ;;  %s204_s23 = sshll.u32 %s202_s30, 4  ;;  %s205_s23 = int_to_ptr.hbm [resolvable:$true] %s204_s23 }
  0x49   : > { %s206_s29 = sshll.u32 %s193_s8, 4  ;;  %s872_s28 = sshra.s32 %s205_s23, 4  ;;  %s207_s29 = int_to_ptr.vmem [resolvable:$true] %s206_s29  ;;  %s873_s28 = int_to_ptr.hbm [resolvable:$true] %s872_s28 }
  0x4a   : > { %s874_s20 = sshrl.u32 %s203_s11, 4  ;;  %s883_s9 = scalar_lea.hbm %s1374_s1, 100 }
  0x4b   : > { %s879_s26 = scalar_lea.hbm %s873_s28, %s874_s20 }
  0x4c   : > { %p880_p3 = scmp.ne.s32.totalorder %s873_s28, %s879_s26  ;;  %p885_p7 = scmp.lt.s32.totalorder %s883_s9, %s879_s26 }
  0x4e   : > { %p881_p5 = pnand %p880_p3, %p719_p0 }
  0x50   : > { %p882_p6 = pneg %p881_p5 }
  0x52   : > { %p887_p10 = pnand %p885_p7, %p882_p6 }
  0x54   : > { %890 = shalt.err (!%p887_p10)
}
  0x55   : > { %s891_s5 = sshra.s32 %s207_s29, 4  ;;  %s1050_s19 = smov [#allocation5]   ;;  %s892_s5 = int_to_ptr.vmem [resolvable:$true] %s891_s5 }
  0x56   : > { %s898_s8 = scalar_lea.vmem %s892_s5, %s874_s20  ;;  %s902_s21 = scalar_lea.vmem %s1050_s19, 26 }
  0x57   : > { %p899_p12 = scmp.ne.s32.totalorder %s892_s5, %s898_s8  ;;  %p904_p2 = scmp.lt.s32.totalorder %s902_s21, %s898_s8 }
  0x59   : > { %p900_p13 = pnand %p899_p12, %p719_p0 }
  0x5b   : > { %p901_p1 = pneg %p900_p13 }
  0x5d   : > { %p906_p3 = pnand %p904_p2, %p901_p1 }
  0x5f   : > { %909 = shalt.err (!%p906_p3)
}
  0x60   : > { %209 = dma.hbm_to_vmem [thread:$0]  (%p719_p0), %s205_s23, %s203_s11, %s207_s29, %s1184_s4  }
  0x61 PF: > { %212 = sbr.rel (!%p1116_p4) target bundleno = 132 (0x84), region = 28  ;;  %s213_s30 = sand.u32 (%p1116_p4), 1, %s1047_s17  }
  0x62   : > { %s215_s28 = sand.u32 (%p1116_p4), 1, %s1035_s14   ;;  %s218_s26 = smul.u32 (%p1116_p4), 13, %s1043_s16 }
  0x63   : > { %s733_s20 = smul.u32 (%p1116_p4), 13, %s215_s28  ;;  %s1214_s7 = scalar_lea.sflag (%p1116_p4), [#allocation6], %s213_s30 }
  0x64   : > { %s219_s6 = ssub.s32 (%p1116_p4), 100, %s218_s26 }
  0x65   : > { %p220_p5 = scmp.lt.s32.totalorder (%p1116_p4), %s219_s6, 13  ;;  %s217_s4 = scalar_lea.vmem (%p1116_p4), [#allocation7], %s733_s20 }
  0x67   : > { %s1400_s6 = smov (!%p220_p5, %s219_s6), 13 }
  0x68   : > { %s222_s10 = ssub.s32 13, %s1400_s6 }
  0x69   : > { %s223_s9 = sshll.u32 %s222_s10, 4 }
  0x6a   : > { %224 = vsyncadd %s1214_s7, %s223_s9  ;;  %p720_p4 = scmp.ne.s32.totalorder %s1400_s6, 0  ;;  %s226_s23 = scalar_lea.hbm %s1375_s2, %s218_s26 }
  0x6b   : > { %s227_s29 = sshll.u32 %s1400_s6, 4  ;;  %s228_s5 = sshll.u32 %s226_s23, 4  ;;  %s229_s5 = int_to_ptr.hbm [resolvable:$true] %s228_s5 }
  0x6c   : > { %s230_s8 = sshll.u32 %s217_s4, 4  ;;  %s911_s19 = sshra.s32 %s229_s5, 4  ;;  %s231_s8 = int_to_ptr.vmem [resolvable:$true] %s230_s8  ;;  %s912_s19 = int_to_ptr.hbm [resolvable:$true] %s911_s19 }
  0x6d   : > { %s913_s21 = sshrl.u32 %s227_s29, 4  ;;  %s922_s10 = scalar_lea.hbm %s1375_s2, 100 }
  0x6e   : > { %s918_s30 = scalar_lea.hbm %s912_s19, %s913_s21 }
  0x6f   : > { %p919_p0 = scmp.ne.s32.totalorder %s912_s19, %s918_s30  ;;  %p924_p10 = scmp.lt.s32.totalorder %s922_s10, %s918_s30 }
  0x71   : > { %p920_p6 = pnand %p919_p0, %p720_p4 }
  0x73   : > { %p921_p7 = pneg %p920_p6 }
  0x75   : > { %p926_p12 = pnand %p924_p10, %p921_p7 }
  0x77   : > { %929 = shalt.err (!%p926_p12)
}
  0x78   : > { %s930_s26 = sshra.s32 %s231_s8, 4  ;;  %s1051_s4 = smov [#allocation7]   ;;  %s931_s26 = int_to_ptr.vmem [resolvable:$true] %s930_s26 }
  0x79   : > { %s937_s9 = scalar_lea.vmem %s931_s26, %s913_s21  ;;  %s941_s22 = scalar_lea.vmem %s1051_s4, 26 }
  0x7a   : > { %p938_p13 = scmp.ne.s32.totalorder %s931_s26, %s937_s9  ;;  %p943_p3 = scmp.lt.s32.totalorder %s941_s22, %s937_s9 }
  0x7c   : > { %p939_p1 = pnand %p938_p13, %p720_p4 }
  0x7e   : > { %p940_p2 = pneg %p939_p1 }
  0x80   : > { %p945_p5 = pnand %p943_p3, %p940_p2 }
  0x82   : > { %948 = shalt.err (!%p945_p5)
}
  0x83   : > { %233 = dma.hbm_to_vmem [thread:$0]  (%p720_p4), %s229_s5, %s227_s29, %s231_s8, %s1214_s7  }
  0x84 PF: > { %p721_p0 = scmp.ge.s32.totalorder %s1047_s17, 1  ;;  %p235_p6 = scmp.lt.s32.totalorder %s1047_s17, 9 }
  0x86   : > { %p236_p7 = pnand %p721_p0, %p235_p6 }
  0x87   : > { %s1239_s11 = sand.u32 (!%p236_p7), 1, %s1031_s13  }
  0x88   : > { %239 = sbr.rel (%p236_p7) target bundleno = 226 (0xe2), region = 32  ;;  %s242_s19 = scalar_lea.sflag (!%p236_p7), [#allocation3], %s1239_s11 }
  0x89   : > { %s734_s23 = smul.u32 (!%p236_p7), 52, %s1239_s11 }
  0x8b   : > { %s245_s6 = scalar_lea.vmem (!%p236_p7), [#allocation2], %s734_s23 }
  0x8d   : > { %1014 = dma.done.wait (%p1124_p8), %s242_s19, 832  }
  0x8e   : > { %1016 = vsyncadd (%p1124_p8), %s242_s19, 4294966464  ;;  %s251_s7 = sand.u32 1, %s1104_s18   ;;  %s735_s29 = smul.u32 13, %s1239_s11 }
  0x8f   : > { %s252_s5 = scalar_lea.sflag [#allocation6], %s251_s7 }
  0x90   : > { %s1251_s8 = scalar_lea.vmem [#allocation5], %s735_s29 }
  0x91   : > { %1018 = dma.done.wait (%p1124_p8), %s252_s5, 416  }
  0x92   : > { %1020 = vsyncadd (%p1124_p8), %s252_s5, 4294966880  ;;  %v317_v0 = vld [vmem:[%s245_s6] sm:$0xff]  ;;  %v318_v1 = vld [vmem:[%s245_s6 + $0x8] sm:$0xff]  ;;  %s265_s18 = scalar_lea.vmem [#allocation7], %s735_s29  ;;  %vm537_vm0 = vcmask 1043456   ;;  %s1296_s24 = scalar_lea.vmem [#allocation8], %s734_s23 }
  0x93   : > { %v319_v2 = vld [vmem:[%s245_s6 + $0x10] sm:$0xff]  ;;  %793 = vlog2.f32 %v317_v0  ;;  %v320_v3 = vld [vmem:[%s245_s6 + $0x18] sm:$0xff]  ;;  %v321_v4 = vld [vmem:[%s245_s6 + $0x20] sm:$0xff]  ;;  %s558_s21 = scalar_lea.sflag [#allocation4], %s1239_s11  ;;  %s565_s30 = smul.u32 (%p1128_p9), 13, %s1039_s15 }
  0x94   : > { %795 = vlog2.f32 %v318_v1  ;;  %v322_v5 = vld [vmem:[%s245_s6 + $0x28] sm:$0xff]  ;;  %v323_v6 = vld [vmem:[%s245_s6 + $0x30] sm:$0xf] }
  0x95   : > { %797 = vlog2.f32 %v319_v2  ;;  %v1258_v7 = vld [vmem:[%s1251_s8] sm:$0xff]  ;;  %v1271_v27 = vld [vmem:[%s1251_s8 + $0x8] sm:$0x1f]  ;;  %s566_s28 = ssub.s32 (%p1128_p9), 100, %s565_s30 }
  0x96   : > { %799 = vlog2.f32 %v320_v3  ;;  %v1260_v8 = vld [vmem:[%s265_s18] sm:$0xff]  ;;  %v342_v12 = vperm.slane %v1258_v7, 0  ;;  %v343_v15 = vperm.slane %v1258_v7, 1  ;;  %v344_v17 = vperm.slane %v1258_v7, 2  ;;  %v1273_v28 = vld [vmem:[%s265_s18 + $0x8] sm:$0x1f] }
  0x97   : > { %801 = vlog2.f32 %v321_v4  ;;  %v428_v16 = vperm.slane %v1260_v8, 0  ;;  %v429_v20 = vperm.slane %v1260_v8, 1  ;;  %v345_v21 = vperm.slane %v1258_v7, 3  ;;  %p567_p8 = scmp.lt.s32.totalorder (%p1128_p9), %s566_s28, 13 }
  0x98   : > { %803 = vlog2.f32 %v322_v5  ;;  %v430_v24 = vperm.slane %v1260_v8, 2  ;;  %v431_v25 = vperm.slane %v1260_v8, 3  ;;  %v346_v30 = vperm.slane %v1258_v7, 4 }
  0x99   : > { %v794_v9 = vpop.eup %793  ;;  %805 = vlog2.f32 %v323_v6  ;;  %v347_v31 = vperm.slane %v1258_v7, 5  ;;  %v432_v32 = vperm.slane %v1260_v8, 4  ;;  %v433_v33 = vperm.slane %v1260_v8, 5 }
  0x9a   : > { %v796_v10 = vpop.eup %795  ;;  %v327_v11 = vmul.f32 0.6931472, %v794_v9  ;;  %v348_v35 = vperm.slane %v1258_v7, 6  ;;  %v349_v36 = vperm.slane %v1258_v7, 7  ;;  %v434_v37 = vperm.slane %v1260_v8, 6 }
  0x9b   : > { %v798_v13 = vpop.eup %797  ;;  %v329_v14 = vmul.f32 0.6931472, %v796_v10  ;;  %v435_v38 = vperm.slane %v1260_v8, 7  ;;  %v350_v39 = vperm.slane %v1271_v27, 0  ;;  %v351_v40 = vperm.slane %v1271_v27, 1 }
  0x9c   : > { %v800_v18 = vpop.eup %799  ;;  %375 = vst [vmem:[#allocation1] ss:$2 sm:$0xff] %v327_v11  ;;  %v331_v19 = vmul.f32 0.6931472, %v798_v13  ;;  %v436_v41 = vperm.slane %v1273_v28, 0  ;;  %v437_v44 = vperm.slane %v1273_v28, 1 }
  0x9d   : > { %v802_v22 = vpop.eup %801  ;;  %377 = vst [vmem:[#allocation1 + $0x10] ss:$2 sm:$0xff] %v329_v14  ;;  %v333_v23 = vmul.f32 0.6931472, %v800_v18  ;;  %v352_v45 = vperm.slane %v1271_v27, 2  ;;  %v353_v51 = vperm.slane %v1271_v27, 3 }
  0x9e   : > { %v804_v26 = vpop.eup %803  ;;  %379 = vst [vmem:[#allocation1 + $0x20] ss:$2 sm:$0xff] %v331_v19  ;;  %v335_v34 = vmul.f32 0.6931472, %v802_v22  ;;  %v438_v63 = vperm.slane %v1273_v28, 2  ;;  %v354_v11 = vperm.slane %v1271_v27, 4 }
  0x9f   : > { %v806_v29 = vpop.eup %805  ;;  %381 = vst [vmem:[#allocation1 + $0x30] ss:$2 sm:$0xff] %v333_v23  ;;  %v337_v42 = vmul.f32 0.6931472, %v804_v26  ;;  %v439_v18 = vperm.slane %v1273_v28, 3  ;;  %v440_v19 = vperm.slane %v1273_v28, 4 }
  0xa0   : > { %v339_v43 = vmul.f32 0.6931472, %v806_v29 }
  0xa3   : > { %v382_v46 = vld.sshfl [vmem:[#allocation1] sm:$0xff pattern:$0x75316420]  ;;  %v383_v47 = vld.sshfl [vmem:[#allocation1 + $0x8] sm:$0xff pattern:$0x75316420] }
  0xa4   : > { %390 = vst [vmem:[#allocation1] ss:$2 sm:$0xff] %v335_v34  ;;  %v411_v48 = vmul.f32 %v382_v46, %v342_v12  ;;  %v412_v49 = vmul.f32 %v383_v47, %v343_v15  ;;  %v384_v50 = vld.sshfl [vmem:[#allocation1 + $0x10] sm:$0xff pattern:$0x75316420] }
  0xa5   : > { %v385_v52 = vld.sshfl [vmem:[#allocation1 + $0x18] sm:$0xff pattern:$0x75316420]  ;;  %v413_v53 = vmul.f32 %v384_v50, %v344_v17  ;;  %v386_v54 = vld.sshfl [vmem:[#allocation1 + $0x20] sm:$0xff pattern:$0x75316420] }
  0xa6   : > { %v454_v55 = vadd.f32 %v428_v16, %v411_v48  ;;  %v455_v56 = vadd.f32 %v429_v20, %v412_v49  ;;  %391 = vst [vmem:[#allocation1 + $0x10] ss:$2 sm:$0xff] %v337_v42  ;;  %v414_v57 = vmul.f32 %v385_v52, %v345_v21  ;;  %v387_v58 = vld.sshfl [vmem:[#allocation1 + $0x28] sm:$0xff pattern:$0x75316420]  ;;  %v415_v59 = vmul.f32 %v386_v54, %v346_v30 }
  0xa7   : > { %v456_v60 = vadd.f32 %v430_v24, %v413_v53  ;;  %392 = vst [vmem:[#allocation1 + $0x20] ss:$2 sm:$0xff] %v339_v43  ;;  %v416_v61 = vmul.f32 %v387_v58, %v347_v31  ;;  %v388_v62 = vld.sshfl [vmem:[#allocation1 + $0x30] sm:$0xff pattern:$0x75316420] }
  0xa8   : > { %v468_v0 = vmul.f32 -0.5, %v455_v56  ;;  %v457_v1 = vadd.f32 %v431_v25, %v414_v57  ;;  %v458_v2 = vadd.f32 %v432_v32, %v415_v59  ;;  %v467_v3 = vmul.f32 -0.5, %v454_v55  ;;  %v389_v4 = vld.sshfl [vmem:[#allocation1 + $0x38] sm:$0xff pattern:$0x75316420] }
  0xa9   : > { %v459_v5 = vadd.f32 %v433_v33, %v416_v61  ;;  %v469_v6 = vmul.f32 -0.5, %v456_v60  ;;  %v417_v7 = vmul.f32 %v388_v62, %v348_v35  ;;  %v418_v8 = vmul.f32 %v389_v4, %v349_v36 }
  0xaa   : > { %v470_v9 = vmul.f32 -0.5, %v457_v1  ;;  %807 = vtanh.f32 %v467_v3  ;;  %v471_v10 = vmul.f32 -0.5, %v458_v2 }
  0xab   : > { %v472_v12 = vmul.f32 -0.5, %v459_v5  ;;  %809 = vtanh.f32 %v468_v0  ;;  %v460_v13 = vadd.f32 %v434_v37, %v417_v7  ;;  %v461_v14 = vadd.f32 %v435_v38, %v418_v8  ;;  %v393_v15 = vld.sshfl [vmem:[#allocation1] sm:$0xff pattern:$0x75316420] }
  0xac   : > { %811 = vtanh.f32 %v469_v6  ;;  %v394_v16 = vld.sshfl [vmem:[#allocation1 + $0x8] sm:$0xff pattern:$0x75316420]  ;;  %v419_v17 = vmul.f32 %v393_v15, %v350_v39 }
  0xad   : > { %813 = vtanh.f32 %v470_v9  ;;  %v473_v20 = vmul.f32 -0.5, %v460_v13  ;;  %v474_v21 = vmul.f32 -0.5, %v461_v14  ;;  %v420_v22 = vmul.f32 %v394_v16, %v351_v40  ;;  %v395_v23 = vld.sshfl [vmem:[#allocation1 + $0x10] sm:$0xff pattern:$0x75316420] }
  0xae   : > { %815 = vtanh.f32 %v471_v10  ;;  %v462_v24 = vadd.f32 %v436_v41, %v419_v17  ;;  %v396_v25 = vld.sshfl [vmem:[#allocation1 + $0x18] sm:$0xff pattern:$0x75316420]  ;;  %v421_v26 = vmul.f32 %v395_v23, %v352_v45  ;;  %v397_v27 = vld.sshfl [vmem:[#allocation1 + $0x20] sm:$0xff pattern:$0x75316420] }
  0xaf   : > { %817 = vtanh.f32 %v472_v12  ;;  %v463_v29 = vadd.f32 %v437_v44, %v420_v22  ;;  %v422_v30 = vmul.f32 %v396_v25, %v353_v51  ;;  %v423_v31 = vmul.f32 %v397_v27, %v354_v11 }
  0xb0   : > { %v808_v32 = vpop.eup %807  ;;  %819 = vtanh.f32 %v473_v20  ;;  %v475_v33 = vmul.f32 -0.5, %v462_v24  ;;  %v464_v34 = vadd.f32 %v438_v63, %v421_v26 }
  0xb1   : > { %v810_v35 = vpop.eup %809  ;;  %v493_v28 = vadd.f32 1.0, %v808_v32  ;;  %821 = vtanh.f32 %v474_v21  ;;  %v476_v36 = vmul.f32 -0.5, %v463_v29  ;;  %v465_v37 = vadd.f32 %v439_v18, %v422_v30 }
  0xb2   : > { %v812_v38 = vpop.eup %811  ;;  %v494_v39 = vadd.f32 1.0, %v810_v35  ;;  %823 = vtanh.f32 %v475_v33  ;;  %v477_v40 = vmul.f32 -0.5, %v464_v34  ;;  %v466_v41 = vadd.f32 %v440_v19, %v423_v31 }
  0xb3   : > { %v814_v42 = vpop.eup %813  ;;  %v495_v43 = vadd.f32 1.0, %v812_v38  ;;  %825 = vtanh.f32 %v476_v36  ;;  %v478_v44 = vmul.f32 -0.5, %v465_v37  ;;  %v506_v50 = vmul.f32 0.5, %v493_v28 }
  0xb4   : > { %v816_v45 = vpop.eup %815  ;;  %v507_v46 = vmul.f32 0.5, %v494_v39  ;;  %v496_v47 = vadd.f32 1.0, %v814_v42  ;;  %827 = vtanh.f32 %v477_v40  ;;  %v479_v48 = vmul.f32 -0.5, %v466_v41 }
  0xb5   : > { %v818_v49 = vpop.eup %817  ;;  %v497_v51 = vadd.f32 1.0, %v816_v45  ;;  %829 = vtanh.f32 %v478_v44  ;;  %v508_v57 = vmul.f32 0.5, %v495_v43 }
  0xb6   : > { %v820_v52 = vpop.eup %819  ;;  %v531_v53 = vrot.slane %v507_v46, 4  ;;  %v509_v54 = vmul.f32 0.5, %v496_v47  ;;  %v498_v55 = vadd.f32 1.0, %v818_v49  ;;  %831 = vtanh.f32 %v479_v48 }
  0xb7   : > { %v822_v56 = vpop.eup %821  ;;  %v510_v58 = vmul.f32 0.5, %v497_v51  ;;  %v499_v59 = vadd.f32 1.0, %v820_v52 }
  0xb8   : > { %v824_v60 = vpop.eup %823  ;;  %v538_v61 = vsel %vm537_vm0, %v506_v50, %v531_v53  ;;  %v532_v62 = vrot.slane %v509_v54, 4  ;;  %v511_v63 = vmul.f32 0.5, %v498_v55  ;;  %v500_v0 = vadd.f32 1.0, %v822_v56 }
  0xb9   : > { %v826_v1 = vpop.eup %825  ;;  %550 = vst [vmem:[%s1296_s24] sm:$0xff] %v538_v61  ;;  %v512_v2 = vmul.f32 0.5, %v499_v59  ;;  %v501_v3 = vadd.f32 1.0, %v824_v60 }
  0xba   : > { %v828_v4 = vpop.eup %827  ;;  %v539_v5 = vsel %vm537_vm0, %v508_v57, %v532_v62  ;;  %v533_v6 = vrot.slane %v511_v63, 4  ;;  %v513_v7 = vmul.f32 0.5, %v500_v0  ;;  %v502_v8 = vadd.f32 1.0, %v826_v1 }
  0xbb   : > { %v830_v9 = vpop.eup %829  ;;  %551 = vst [vmem:[%s1296_s24 + $0x8] sm:$0xff] %v539_v5  ;;  %v503_v10 = vadd.f32 1.0, %v828_v4  ;;  %v514_v18 = vmul.f32 0.5, %v501_v3 }
  0xbc   : > { %v832_v11 = vpop.eup %831  ;;  %v540_v12 = vsel %vm537_vm0, %v510_v58, %v533_v6  ;;  %v534_v13 = vrot.slane %v513_v7, 4  ;;  %v515_v14 = vmul.f32 0.5, %v502_v8  ;;  %v504_v15 = vadd.f32 1.0, %v830_v9 }
  0xbd   : > { %552 = vst [vmem:[%s1296_s24 + $0x10] sm:$0xff] %v540_v12  ;;  %v505_v16 = vadd.f32 1.0, %v832_v11  ;;  %v516_v23 = vmul.f32 0.5, %v503_v10 }
  0xbe   : > { %v541_v17 = vsel %vm537_vm0, %v512_v2, %v534_v13  ;;  %v535_v19 = vrot.slane %v515_v14, 4  ;;  %v517_v20 = vmul.f32 0.5, %v504_v15 }
  0xbf   : > { %553 = vst [vmem:[%s1296_s24 + $0x18] sm:$0xff] %v541_v17  ;;  %v518_v21 = vmul.f32 0.5, %v505_v16  ;;  %564 = sbr.rel (!%p1128_p9) target bundleno = 226 (0xe2), region = 48 }
  0xc0   : > { %v542_v22 = vsel %vm537_vm0, %v514_v18, %v535_v19  ;;  %v536_v24 = vrot.slane %v517_v20, 4 }
  0xc1   : > { %554 = vst [vmem:[%s1296_s24 + $0x20] sm:$0xff] %v542_v22 }
  0xc2   : > { %v543_v25 = vsel %vm537_vm0, %v516_v23, %v536_v24  ;;  %556 = vst [vmem:[%s1296_s24 + $0x30] sm:$0xf] %v518_v21 }
  0xc3   : > { %555 = vst [vmem:[%s1296_s24 + $0x28] sm:$0xff] %v543_v25 }
  0xc4   : > { %s1402_s28 = smov (!%p567_p8, %s566_s28), 13 }
  0xc5   : > { %s722_s20 = sshll.u32 %s1402_s28, 2 }
  0xc6   : > { %s570_s10 = ssub.s32 52, %s722_s20 }
  0xc7   : > { %s571_s26 = sshll.u32 %s570_s10, 4 }
  0xc8   : > { %572 = vsyncadd %s558_s21, %s571_s26  ;;  %p1319_p4 = scmp.ne.s32.totalorder %s722_s20, 0  ;;  %s730_s9 = smul.u32 52, %s1039_s15 }
  0xc9   : > { %s726_s4 = sshll.u32 %s1402_s28, 6  ;;  %s580_s22 = sshll.u32 %s1296_s24, 4  ;;  %s1329_s22 = int_to_ptr.vmem [resolvable:$true] %s580_s22 }
  0xca   : > { %s577_s6 = scalar_lea.hbm %s1376_s3, %s730_s9  ;;  %s950_s29 = sshra.s32 %s1329_s22, 4  ;;  %s951_s29 = int_to_ptr.vmem [resolvable:$true] %s950_s29 }
  0xcb   : > { %s582_s7 = sshll.u32 %s577_s6, 4  ;;  %s952_s5 = sshrl.u32 %s726_s4, 4  ;;  %s583_s7 = int_to_ptr.hbm [resolvable:$true] %s582_s7 }
  0xcc   : > { %s957_s8 = scalar_lea.vmem %s951_s29, %s952_s5  ;;  %s1052_s15 = smov [#allocation8]  }
  0xcd   : > { %p958_p9 = scmp.ne.s32.totalorder %s951_s29, %s957_s8  ;;  %s961_s18 = scalar_lea.vmem %s1052_s15, 104 }
  0xce   : > { %p963_p13 = scmp.lt.s32.totalorder %s961_s18, %s957_s8 }
  0xcf   : > { %p959_p10 = pnand %p958_p9, %p1319_p4 }
  0xd1   : > { %p960_p12 = pneg %p959_p10 }
  0xd3   : > { %p965_p1 = pnand %p963_p13, %p960_p12 }
  0xd5   : > { %968 = shalt.err (!%p965_p1)
}
  0xd6   : > { %s969_s24 = sshra.s32 %s583_s7, 4  ;;  %s980_s26 = scalar_lea.hbm %s1376_s3, 400  ;;  %s970_s24 = int_to_ptr.hbm [resolvable:$true] %s969_s24 }
  0xd7   : > { %s976_s30 = scalar_lea.hbm %s970_s24, %s952_s5  ;;  %p981_p0 = scmp.lt.s32.totalorder %s970_s24, %s1376_s3 }
  0xd8   : > { %p977_p2 = scmp.ne.s32.totalorder %s970_s24, %s976_s30  ;;  %p982_p6 = scmp.lt.s32.totalorder %s980_s26, %s976_s30 }
  0xda   : > { %p978_p3 = pnand %p977_p2, %p1319_p4  ;;  %p983_p7 = por %p982_p6, %p981_p0 }
  0xdc   : > { %p979_p5 = pneg %p978_p3 }
  0xde   : > { %p984_p8 = pnand %p983_p7, %p979_p5 }
  0xe0   : > { %987 = shalt.err (!%p984_p8)
}
  0xe1   : > { %585 = dma.vmem_to_hbm [thread:$0]  (%p1319_p4), %s1329_s22, %s726_s4, %s583_s7, %s558_s21  }
  0xe2 PF: > { %p744_p9 = scmp.ge.s32.totalorder %s1047_s17, 2  ;;  %s594_s19 = sand.u32 1, %s1027_s12  }
  0xe3   : > { %s595_s6 = scalar_lea.sflag [#allocation4], %s594_s19 }
  0xe4   : > { %p741_p10 = pnand %p744_p9, %p1135_p11 }
  0xe6   : > { %p742_p12 = pneg %p741_p10 }
  0xe8   : > { %1022 = dma.done.wait (%p742_p12), %s595_s6, 832  }
  0xe9   : > { %1024 = vsyncadd (%p742_p12), %s595_s6, 4294966464  ;;  %s22_s17 = sadd.s32 1, %s1047_s17   ;;  %s1386_s11 = sld [smem:[#allocation13_spill]] }
  0xea   : > { %p19_p13 = scmp.ge.s32.totalorder %s22_s17, 10   ;;  %s1387_s21 = sld [smem:[#allocation12_spill]] }
  0xeb   : > { %s1388_s12 = smov %s1031_s13  ;;  %s1389_s13 = smov %s1035_s14 }
  0xec   : > { %s1391_s15 = smov %s1043_s16  ;;  %21 = sbr.rel (!%p19_p13) target bundleno = 8 (0x8), region = 104 }
  0xef   : > { %s1390_s14 = smov %s1386_s11 }
  0xf0   : > { %s1392_s16 = smov %s1387_s21 }
  0xf1   :  { %601 = vsyncpa [#allocation3], 1 }
  0xf2   :  { %603 = vsyncpa [#allocation3 + $0x1], 1 }
  0xf3   :  { %604 = vsyncpa [#allocation6], 1 }
  0xf4   :  { %606 = vsyncpa [#allocation6 + $0x1], 1 }
  0xf5   :  { %607 = vsyncpa [#allocation4], 1 }
  0xf6   :  { %609 = vsyncpa [#allocation4 + $0x1], 1 }

</bundles_post_ra>
